<compile_context>
chip_gen: v7x
topology: tpu7x:2x2x1
jax: 0.10.0
libtpu: 0.0.40
codegen_flags: <defaults>
</compile_context>

<pallas_src>
import jax
import jax.numpy as jnp
import numpy as np
from jax import lax
from jax.experimental import pallas as pl
from jax.experimental.pallas import tpu as pltpu


def embedbag_linear_kernel(mask_ref, emb_ref, w_ref, o_ref):
    # Linear with W kept in torch (out, in) layout: contract emb axis 1 with W axis 1,
    # i.e. embed_weight[0:1] @ W^T without any host/in-kernel transpose copy.
    y0 = lax.dot_general(
        emb_ref[...],                      # (1, dim_in)
        w_ref[...],                        # (dim_out, dim_in)
        dimension_numbers=(((1,), (1,)), ((), ())),
        preferred_element_type=jnp.float32,
    )                                      # -> (1, dim_out)

    # vocab == 1: mean-pooled bag == embed_weight[0] for non-empty bags, 0 for empty.
    # Broadcast the single linear row to all bags and zero empty ones.
    o_ref[...] = mask_ref[...] * y0        # (nb, 1) * (1, dim) -> (nb, dim)


def my_model_forward(input_ids, offsets, embed_weight, linear_weight):
    """input_ids:     (N,)  int32 indices (num_embeddings=1 -> all valid indices are 0)
       offsets:       (B,)  int32 bag start offsets (torch EmbeddingBag semantics)
       embed_weight:  (1, dim)   f32
       linear_weight: (dim, dim) f32 (torch (out, in) layout; transpose folded in-kernel)
    """
    n = input_ids.shape[0]                 # only the number of indices matters (vocab=1)
    nb = offsets.shape[0]
    dim = embed_weight.shape[1]

    starts = offsets.astype(jnp.int32)
    ends = jnp.concatenate([starts[1:], jnp.full((1,), n, dtype=jnp.int32)])
    nonempty = (ends > starts).astype(jnp.float32).reshape(nb, 1)   # tiny (nb,1) mask

    vmem = pl.BlockSpec(memory_space=pltpu.MemorySpace.VMEM)
    return pl.pallas_call(
        embedbag_linear_kernel,
        out_shape=jax.ShapeDtypeStruct((nb, dim), jnp.float32),
        in_specs=[vmem, vmem, vmem],
        out_specs=vmem,
    )(nonempty, embed_weight, linear_weight)


if __name__ == "__main__":
    dim = 16
    num_indices = 8
    key = jax.random.PRNGKey(0)
    k_emb, k_lin = jax.random.split(key)

    # Parameters per __init__: EmbeddingBag(1, dim), Linear(dim, dim, bias=False)
    embed_weight = jax.random.normal(k_emb, (1, dim), dtype=jnp.float32)
    linear_weight = jax.random.normal(k_lin, (dim, dim), dtype=jnp.float32)

    # Inputs: vocab size is 1 so all indices are 0.
    # Three bags: [0:3), [3:3) (empty -> zero row), [3:8).
    input_ids = jnp.zeros((num_indices,), dtype=jnp.int32)
    offsets = jnp.array([0, 3, 3], dtype=jnp.int32)

    y = my_model_forward(input_ids, offsets, embed_weight, linear_weight)
    y = jax.block_until_ready(y)

    # Pure-numpy reference: EmbeddingBag mean mode (empty bags -> zeros), then linear.
    emb_np = np.asarray(embed_weight)[np.asarray(input_ids)]
    starts_np = np.asarray(offsets)
    ends_np = np.concatenate([starts_np[1:], np.array([num_indices], dtype=np.int32)])
    pooled_ref = np.stack([
        emb_np[s:e].mean(axis=0) if e > s else np.zeros((dim,), np.float32)
        for s, e in zip(starts_np, ends_np)
    ]).astype(np.float32)
    y_ref = pooled_ref @ np.asarray(linear_weight).T

    assert y.shape == (offsets.shape[0], dim)
    assert np.allclose(np.asarray(y), y_ref, rtol=1e-5, atol=1e-5)

    print("KERNEL_OK")
</pallas_src>

<mosaic_0001>
module attributes {stable_mosaic.version = 11 : i64} {
  func.func @embedbag_linear_kernel(%arg0: memref<3x1xf32, #tpu.memory_space<vmem>>, %arg1: memref<1x16xf32, #tpu.memory_space<vmem>>, %arg2: memref<16x16xf32, #tpu.memory_space<vmem>>, %arg3: memref<3x16xf32, #tpu.memory_space<vmem>>) attributes {dimension_semantics = [], scalar_prefetch = 0 : i64, scratch_operands = 0 : i64, tpu.core_type = #tpu.core_type<tc>} {
    %c0 = arith.constant 0 : index
    %c0_0 = arith.constant 0 : index
    %0 = vector.load %arg1[%c0, %c0_0] : memref<1x16xf32, #tpu.memory_space<vmem>>, vector<1x16xf32>
    %c0_1 = arith.constant 0 : index
    %c0_2 = arith.constant 0 : index
    %1 = vector.load %arg2[%c0_1, %c0_2] : memref<16x16xf32, #tpu.memory_space<vmem>>, vector<16x16xf32>
    %cst = arith.constant dense<0.000000e+00> : vector<1x16xf32>
    %2 = tpu.matmul %0, %1, %cst {dimension_numbers = #tpu.dot_dimension_numbers<[1], [1], [0], [0], [0, 0, 1, 0], [], []>} : vector<1x16xf32>, vector<16x16xf32>, vector<1x16xf32> -> vector<1x16xf32>
    %c0_3 = arith.constant 0 : index
    %c0_4 = arith.constant 0 : index
    %3 = vector.load %arg0[%c0_3, %c0_4] : memref<3x1xf32, #tpu.memory_space<vmem>>, vector<3x1xf32>
    %4 = vector.broadcast %3 : vector<3x1xf32> to vector<3x16xf32>
    %5 = vector.broadcast %2 : vector<1x16xf32> to vector<3x16xf32>
    %6 = arith.mulf %4, %5 : vector<3x16xf32>
    %c0_5 = arith.constant 0 : index
    %c0_6 = arith.constant 0 : index
    %7 = vector.load %arg3[%c0_5, %c0_6] : memref<3x16xf32, #tpu.memory_space<vmem>>, vector<3x16xf32>
    tpu.vector_store %arg3[%c0_5, %c0_6], %6 {strides = array<i32>} : memref<3x16xf32, #tpu.memory_space<vmem>>, vector<3x16xf32>,
    return
  }
}

</mosaic_0001>

<bundles_post_ra>
// kernel: tpu_custom_call.1
= control target key start
LH: loop header
LB: loop body
LE: loop exit
PB: predicated region body
PF: predicated region fallthrough
CT: control target
= control target key end

     0   :  { %8 = vsyncpa [#allocation3], 0  ;;  %s272_s0 = inlined_call_operand.vmem [shape: f32[3,1], index: 0, kind: input, shape index: {}]   ;;  %s273_s1 = inlined_call_operand.vmem [shape: f32[1,16], index: 1, kind: input, shape index: {}]   ;;  %s274_s2 = inlined_call_operand.hbm [shape: f32[16,16], index: 2, kind: input, shape index: {}]   ;;  %s275_s3 = inlined_call_operand.hbm [shape: f32[3,16], index: 3, kind: output, shape index: {}]  }
   0x1   :  { %9 = vsyncpa [#allocation4], 0  ;;  %s214_s12 = smov [#allocation2]   ;;  %s166_s16 = scalar_lea.hbm %s274_s2, 256 }
   0x2   :  { %s19_s13 = sshll.u32 %s214_s12, 4  ;;  %p167_p0 = scmp.ne.s32.totalorder %s274_s2, %s166_s16  ;;  %s20_s13 = int_to_ptr.vmem [resolvable:$true] %s19_s13 }
   0x3   :  { %p170_p1 = scmp.lt.u32.totalorder %s166_s16, %s274_s2 }
   0x5   :  { %p172_p2 = pnand %p170_p1, %p167_p0 }
   0x7   :  { %175 = shalt.err (!%p172_p2)
}
   0x8   :  { %s176_s21 = scalar_lea.vmem %s20_s13, 256  ;;  %p181_p4 = scmp.lt.s32.totalorder %s20_s13, %s20_s13 }
   0x9   :  { %p177_p3 = scmp.ne.s32.totalorder %s20_s13, %s176_s21  ;;  %p182_p5 = scmp.lt.s32.totalorder %s176_s21, %s176_s21 }
   0xb   :  { %p183_p6 = por %p182_p5, %p181_p4 }
   0xd   :  { %p184_p7 = pnand %p183_p6, %p177_p3 }
   0xf   :  { %187 = shalt.err (!%p184_p7)
}
  0x10   :  { %s215_s22 = smov 128   ;;  %s216_s23 = smov 8  }
  0x11   :  { %25 = dma.hbm_to_vmem [thread:$0]  %s274_s2, 256, %s20_s13, [#allocation3], %s215_s22, %s215_s22, %s216_s23  }
  0x12   :  { %210 = dma.done.wait [#allocation3], 256  }
  0x13   :  { %211 = vsyncadd [#allocation3], 4294967040  ;;  %v217_v0 = vmov 0.0|0.0   ;;  %vm218_vm0 = vmmov 0   ;;  %v219_v1 = vmov 0.0   ;;  %v220_v2 = vmov 0  }
  0x14   :  { %153 = vmatprep.subr.bf16.mxu0 %v217_v0  ;;  %150 = vmatprep.mubr.msk.f32.mxu0 %vm218_vm0, %v219_v1  ;;  %vm32_vm1 = vcmask 130048   ;;  %v30_v3 = vld [vmem:[#allocation2] sm:$0xff]  ;;  %v31_v4 = vld [vmem:[#allocation2 + $0x8] sm:$0xff]  ;;  %v112_v6 = vld [vmem:[%s272_s0] sm:$0x7]  ;;  %v118_v8 = vlaneseq  ;;  %s221_s29 = smov [#allocation5]  }
  0x15   :  { %165 = vset.pattern.permute.xlu0 %v220_v2  ;;  %vm155_vm2 = vmpackc.low %vm32_vm1, %vm32_vm1  ;;  %v154_v5 = vpack.c.bf16 %v31_v4, %v30_v3  ;;  %v29_v7 = vld [vmem:[%s273_s1] sm:$0x1]  ;;  %s131_s30 = sshll.u32 %s221_s29, 4  ;;  %vm123_vm3 = vcmask 124928   ;;  %s132_s30 = int_to_ptr.vmem [resolvable:$true] %s131_s30 }
  0x16   :  { %115 = vperm.xlu0 %165, %v112_v6   ;;  %v119_v9 = vshrl.u32 %v118_v8, 7  ;;  %s188_s0 = scalar_lea.vmem %s132_s30, 64  ;;  %p193_p9 = scmp.lt.s32.totalorder %s132_s30, %s132_s30 }
  0x17   :  { %156 = vmatpush3.bf16.xpose.msk.msra.mxu0 %vm155_vm2, %v154_v5  ;;  %p189_p8 = scmp.ne.s32.totalorder %s132_s30, %s188_s0  ;;  %p194_p10 = scmp.lt.s32.totalorder %s188_s0, %s188_s0 }
  0x18   :  { %v120_v10 = vsub.s32 0, %v119_v9 }
  0x19   :  { %p195_p11 = por %p194_p10, %p193_p9 }
  0x1b   :  { %p196_p12 = pnand %p195_p11, %p189_p8 }
  0x1e   :  { %151 = vmatmul.mubr.msk.f32.vlgmr.msra.gmra.mrb[0].mxu0 %vm32_vm1, %v29_v7 }
  0x95   :  { %v116_v12 = vpop.permute.xlu0 %115 }
  0xf1   :  { %v108_v11 = vpop.f32.mrb[0].mxu0 }
  0xf2   :  { %v121_v13 = vrot.slane %v108_v11, %v120_v10  ;;  %v152_v14 = vpop.f32.mrb[1].mxu0 }
  0xf4   :  { %v122_v15 = vmul.f32 %v121_v13, %v116_v12 }
  0xf6   :  { %124 = vst.msk [vmem:[#allocation5] sm:$0x7] %vm123_vm3, %v122_v15 }
  0xf7   :  { %199 = shalt.err (!%p196_p12)
}
  0xf8   :  { %s200_s5 = scalar_lea.hbm %s275_s3, 64 }
  0xf9   :  { %p201_p13 = scmp.ne.s32.totalorder %s275_s3, %s200_s5  ;;  %p204_p0 = scmp.lt.u32.totalorder %s200_s5, %s275_s3 }
  0xfb   :  { %p206_p1 = pnand %p204_p0, %p201_p13 }
  0xfd   :  { %209 = shalt.err (!%p206_p1)
}
  0xfe   :  { %134 = dma.vmem_to_hbm [thread:$0]  %s132_s30, 64, %s275_s3, [#allocation4]  }
  0xff   :  { %212 = dma.done.wait [#allocation4], 64  }
 0x100   :  { %213 = vsyncadd [#allocation4], 4294967232 }
 0x101   :  { %138 = vsyncpa [#allocation3], 1 }
 0x102   :  { %139 = vsyncpa [#allocation4], 1 }

</bundles_post_ra>
